<compile_context>
chip_gen: v7x
topology: tpu7x:2x2x1
jax: 0.10.0
libtpu: 0.0.40
codegen_flags: <defaults>
</compile_context>

<pallas_src>
import functools

import jax
import jax.numpy as jnp
from jax.experimental import pallas as pl
from jax.experimental.pallas import tpu as pltpu


IN_DIM = 24 * 6          # 144  (full contraction dim; no wrapper-side K pad)
H1, H2, H3, OUT = 512, 256, 128, 1


def _round_up(n, m):
    return ((n + m - 1) // m) * m


def _cdiv(a, b):
    return (a + b - 1) // b


def _choose_batch_tile(B, tb_max):
    """Pick (tile_rows, num_tiles) for the batch grid.

    - small batches: a single tile, padded only to sublane (x8) granularity,
    - larger batches: adaptive tile so ragged padding waste stays small
      (instead of round_up(B, tb_max), which can waste up to tb_max-1 rows),
    - >= 2 tiles when there is enough work, so v7x's two TensorCores both get
      work from the ("parallel",) grid axis.
    """
    tb_max = max(128, tb_max)
    if B <= 256:
        return _round_up(B, 8), 1
    align = 128 if B >= 1024 else 8
    n_tiles = max(2, _cdiv(B, tb_max))
    tb = _round_up(_cdiv(B, n_tiles), align)
    return tb, _cdiv(B, tb)


def _mlp_kernel(x_ref,                     # (TB, 144)  f32 (cast to bf16 here)
                w1_ref, b1_ref,            # (144, H1) bf16, (1, H1) f32
                w2_ref, b2_ref,            # (H1, H2)  bf16, (1, H2) f32
                w3_ref, b3_ref,            # (H2, H3)  bf16, (1, H3) f32
                w4_ref,                    # (1, H3)   f32 (row vector)
                b4_ref,                    # (1,)      f32, SMEM scalar
                o_ref):                    # (1, TB)   f32 (lane-dense row)
    # Layers 1-3: bf16 operands on the MXU, f32 accumulation; bias+ReLU in f32.
    x = x_ref[...].astype(jnp.bfloat16)                         # VPU cast, in VMEM
    h = jnp.dot(x, w1_ref[...], preferred_element_type=jnp.float32)
    h = jnp.maximum(h + b1_ref[...], 0.0)                       # (TB, 512) f32

    h = jnp.dot(h.astype(jnp.bfloat16), w2_ref[...],
                preferred_element_type=jnp.float32)
    h = jnp.maximum(h + b2_ref[...], 0.0)                       # (TB, 256) f32

    h = jnp.dot(h.astype(jnp.bfloat16), w3_ref[...],
                preferred_element_type=jnp.float32)
    h = jnp.maximum(h + b3_ref[...], 0.0)                       # (TB, 128) f32

    # Final 128 -> 1 layer: an N=1 matmul would use 1/128 (or 1/256) of the
    # MXU columns, so do it as a VPU multiply + cross-lane reduce in f32.
    out = jnp.sum(h * w4_ref[...], axis=-1) + b4_ref[0]         # (TB,)

    # Lane-dense store: one (1, TB) row of the output slab per grid step.
    o_ref[...] = out[None, :].astype(o_ref.dtype)


@functools.partial(jax.jit, static_argnames=("tb_max",))
def heuristic_mlp_forward(x, params, *, tb_max=2048):
    """x: (B, 144) float32.  params: dict w1..w4, b1..b4.  Returns (B, 1) f32."""
    B = x.shape[0]
    assert x.shape[1] == IN_DIM, x.shape

    tb, num_tiles = _choose_batch_tile(B, tb_max)
    rows = num_tiles * tb            # rows the kernel actually processes

    bf16, f32 = jnp.bfloat16, jnp.float32

    # Weights cast to bf16 once (tiny, ~0.5 MiB total); biases / final row f32.
    # x is NOT copied / padded / cast in the wrapper: it is streamed per tile
    # straight from HBM and cast to bf16 inside the kernel.  The last batch
    # tile may extend past B; those out-of-bounds rows hold unspecified data,
    # produce garbage output rows, and are sliced off below (rows are
    # independent in an MLP, so this is exact for the valid rows).
    x32 = x.astype(f32)
    w1 = params["w1"].astype(bf16)                   # (144, 512)
    w2 = params["w2"].astype(bf16)                   # (512, 256)
    w3 = params["w3"].astype(bf16)                   # (256, 128)
    b1 = params["b1"].reshape(1, H1).astype(f32)
    b2 = params["b2"].reshape(1, H2).astype(f32)
    b3 = params["b3"].reshape(1, H3).astype(f32)
    w4 = params["w4"].reshape(1, H3).astype(f32)     # row vector for VPU reduce
    b4 = params["b4"].reshape(1).astype(f32)         # scalar, lives in SMEM

    # Advisory estimate: unpadded K (=144), real x bytes (valid rows only).
    flops = 2 * rows * (IN_DIM * H1 + H1 * H2 + H2 * H3 + H3 * OUT)
    bytes_accessed = (B * IN_DIM * 4
                      + (w1.size + w2.size + w3.size) * 2
                      + (b1.size + b2.size + b3.size + w4.size + b4.size) * 4
                      + rows * 4)

    const = lambda i: (0, 0)   # weights/biases: same block every step -> resident

    slab = pl.pallas_call(
        _mlp_kernel,
        out_shape=jax.ShapeDtypeStruct((num_tiles, tb), f32),
        grid=(num_tiles,),
        in_specs=[
            pl.BlockSpec((tb, IN_DIM), lambda i: (i, 0)),       # x, streamed f32
            pl.BlockSpec((IN_DIM, H1), const),
            pl.BlockSpec((1, H1), const),
            pl.BlockSpec((H1, H2), const),
            pl.BlockSpec((1, H2), const),
            pl.BlockSpec((H2, H3), const),
            pl.BlockSpec((1, H3), const),
            pl.BlockSpec((1, H3), const),                       # w4 row
            pl.BlockSpec(memory_space=pltpu.MemorySpace.SMEM),  # b4 scalar
        ],
        out_specs=pl.BlockSpec((1, tb), lambda i: (i, 0)),      # lane-dense slab
        compiler_params=pltpu.CompilerParams(
            dimension_semantics=("parallel",),                  # shards over TCs
            vmem_limit_bytes=48 * 1024 * 1024,                  # < v7x 64MiB/TC
        ),
        cost_estimate=pl.CostEstimate(
            flops=flops, transcendentals=0, bytes_accessed=bytes_accessed),
    )(x32, w1, b1, w2, b2, w3, b3, w4, b4)

    # (num_tiles, TB) row-major == processed batch order; slice off padding rows.
    return slab.reshape(rows, 1)[:B]


def init_params(key):
    """Matches torch.nn.Linear default init: U(+-1/sqrt(fan_in)) for W and b."""
    dims = [(IN_DIM, H1), (H1, H2), (H2, H3), (H3, OUT)]
    params = {}
    keys = jax.random.split(key, 2 * len(dims))
    for i, (fan_in, fan_out) in enumerate(dims):
        bound = 1.0 / jnp.sqrt(jnp.float32(fan_in))
        params[f"w{i + 1}"] = jax.random.uniform(
            keys[2 * i], (fan_in, fan_out), minval=-bound, maxval=bound,
            dtype=jnp.float32)
        params[f"b{i + 1}"] = jax.random.uniform(
            keys[2 * i + 1], (1, fan_out), minval=-bound, maxval=bound,
            dtype=jnp.float32)
    return params


def reference_forward_bf16(x, params):
    """Same math as the kernel (bf16 MXU operands, f32 accumulate) in plain JAX."""
    bf16, f32 = jnp.bfloat16, jnp.float32
    h = jnp.dot(x.astype(bf16), params["w1"].astype(bf16), preferred_element_type=f32)
    h = jnp.maximum(h + params["b1"], 0.0)
    h = jnp.dot(h.astype(bf16), params["w2"].astype(bf16), preferred_element_type=f32)
    h = jnp.maximum(h + params["b2"], 0.0)
    h = jnp.dot(h.astype(bf16), params["w3"].astype(bf16), preferred_element_type=f32)
    h = jnp.maximum(h + params["b3"], 0.0)
    return jnp.sum(h * params["w4"].reshape(1, -1), axis=-1, keepdims=True) + params["b4"]


def reference_forward_f32(x, params):
    # TODO(synk): kernel uses bf16 MXU operands (f32 accumulate); if bit-close
    # f32 parity with the PyTorch module is required, keep matmul operands f32.
    h = jnp.maximum(x @ params["w1"] + params["b1"], 0.0)
    h = jnp.maximum(h @ params["w2"] + params["b2"], 0.0)
    h = jnp.maximum(h @ params["w3"] + params["b3"], 0.0)
    return h @ params["w4"] + params["b4"]


if __name__ == "__main__":
    key = jax.random.PRNGKey(0)
    pkey, xkey = jax.random.split(key)

    params = init_params(pkey)
    batch = 8
    x = jax.random.normal(xkey, (batch, IN_DIM), dtype=jnp.float32)

    out = heuristic_mlp_forward(x, params)
    out = jax.block_until_ready(out)
    assert out.shape == (batch, OUT), out.shape

    # Tight check vs. a reference doing the identical bf16/f32 math.
    ref = reference_forward_bf16(x, params)
    assert jnp.allclose(out, ref, atol=2e-3, rtol=2e-3), (
        float(jnp.max(jnp.abs(out - ref))))

    # Loose sanity check vs. the full-f32 (PyTorch-equivalent) forward.
    ref32 = reference_forward_f32(x, params)
    assert jnp.allclose(out, ref32, atol=1e-1, rtol=1e-1), (
        float(jnp.max(jnp.abs(out - ref32))))

    print("KERNEL_OK")
</pallas_src>

<mosaic_0001>
module attributes {stable_mosaic.version = 11 : i64} {
  func.func @_mlp_kernel(%arg0: i32, %arg1: memref<8x144xf32, #tpu.memory_space<vmem>>, %arg2: memref<144x512xbf16, #tpu.memory_space<vmem>>, %arg3: memref<1x512xf32, #tpu.memory_space<vmem>>, %arg4: memref<512x256xbf16, #tpu.memory_space<vmem>>, %arg5: memref<1x256xf32, #tpu.memory_space<vmem>>, %arg6: memref<256x128xbf16, #tpu.memory_space<vmem>>, %arg7: memref<1x128xf32, #tpu.memory_space<vmem>>, %arg8: memref<1x128xf32, #tpu.memory_space<vmem>>, %arg9: memref<1xf32, #tpu.memory_space<smem>>, %arg10: memref<1x8xf32, #tpu.memory_space<vmem>>) attributes {dimension_semantics = [#tpu.dimension_semantics<parallel>], iteration_bounds = array<i64: 1>, scalar_prefetch = 0 : i64, scratch_operands = 0 : i64, tpu.core_type = #tpu.core_type<tc>, window_params = [{transform_indices = @transform_0, window_bounds = array<i64: 8, 144>}, {pipeline_mode = #tpu.pipeline_mode<synchronous>, transform_indices = @transform_1, window_bounds = array<i64: 144, 512>}, {pipeline_mode = #tpu.pipeline_mode<synchronous>, transform_indices = @transform_2, window_bounds = array<i64: 1, 512>}, {pipeline_mode = #tpu.pipeline_mode<synchronous>, transform_indices = @transform_3, window_bounds = array<i64: 512, 256>}, {pipeline_mode = #tpu.pipeline_mode<synchronous>, transform_indices = @transform_4, window_bounds = array<i64: 1, 256>}, {pipeline_mode = #tpu.pipeline_mode<synchronous>, transform_indices = @transform_5, window_bounds = array<i64: 256, 128>}, {pipeline_mode = #tpu.pipeline_mode<synchronous>, transform_indices = @transform_6, window_bounds = array<i64: 1, 128>}, {pipeline_mode = #tpu.pipeline_mode<synchronous>, transform_indices = @transform_7, window_bounds = array<i64: 1, 128>}, {transform_indices = @transform_8, window_bounds = array<i64: 1>}, {transform_indices = @transform_9, window_bounds = array<i64: 1, 8>}]} {
    %c0 = arith.constant 0 : index
    %c0_0 = arith.constant 0 : index
    %0 = vector.load %arg1[%c0, %c0_0] : memref<8x144xf32, #tpu.memory_space<vmem>>, vector<8x144xf32>
    %1 = arith.truncf %0 : vector<8x144xf32> to vector<8x144xbf16>
    %c0_1 = arith.constant 0 : index
    %c0_2 = arith.constant 0 : index
    %2 = vector.load %arg2[%c0_1, %c0_2] : memref<144x512xbf16, #tpu.memory_space<vmem>>, vector<144x512xbf16>
    %cst = arith.constant dense<0.000000e+00> : vector<8x512xf32>
    %3 = tpu.matmul %1, %2, %cst {dimension_numbers = #tpu.dot_dimension_numbers<[1], [0], [0], [1], [0, 0, 1, 1], [], []>} : vector<8x144xbf16>, vector<144x512xbf16>, vector<8x512xf32> -> vector<8x512xf32>
    %c0_3 = arith.constant 0 : index
    %c0_4 = arith.constant 0 : index
    %4 = vector.load %arg3[%c0_3, %c0_4] : memref<1x512xf32, #tpu.memory_space<vmem>>, vector<1x512xf32>
    %5 = vector.broadcast %4 : vector<1x512xf32> to vector<8x512xf32>
    %6 = arith.addf %3, %5 : vector<8x512xf32>
    %cst_5 = arith.constant 0.000000e+00 : f32
    %7 = vector.broadcast %cst_5 : f32 to vector<8x512xf32>
    %8 = arith.maximumf %6, %7 : vector<8x512xf32>
    %9 = arith.truncf %8 : vector<8x512xf32> to vector<8x512xbf16>
    %c0_6 = arith.constant 0 : index
    %c0_7 = arith.constant 0 : index
    %10 = vector.load %arg4[%c0_6, %c0_7] : memref<512x256xbf16, #tpu.memory_space<vmem>>, vector<512x256xbf16>
    %cst_8 = arith.constant dense<0.000000e+00> : vector<8x256xf32>
    %11 = tpu.matmul %9, %10, %cst_8 {dimension_numbers = #tpu.dot_dimension_numbers<[1], [0], [0], [1], [0, 0, 1, 1], [], []>} : vector<8x512xbf16>, vector<512x256xbf16>, vector<8x256xf32> -> vector<8x256xf32>
    %c0_9 = arith.constant 0 : index
    %c0_10 = arith.constant 0 : index
    %12 = vector.load %arg5[%c0_9, %c0_10] : memref<1x256xf32, #tpu.memory_space<vmem>>, vector<1x256xf32>
    %13 = vector.broadcast %12 : vector<1x256xf32> to vector<8x256xf32>
    %14 = arith.addf %11, %13 : vector<8x256xf32>
    %cst_11 = arith.constant 0.000000e+00 : f32
    %15 = vector.broadcast %cst_11 : f32 to vector<8x256xf32>
    %16 = arith.maximumf %14, %15 : vector<8x256xf32>
    %17 = arith.truncf %16 : vector<8x256xf32> to vector<8x256xbf16>
    %c0_12 = arith.constant 0 : index
    %c0_13 = arith.constant 0 : index
    %18 = vector.load %arg6[%c0_12, %c0_13] : memref<256x128xbf16, #tpu.memory_space<vmem>>, vector<256x128xbf16>
    %cst_14 = arith.constant dense<0.000000e+00> : vector<8x128xf32>
    %19 = tpu.matmul %17, %18, %cst_14 {dimension_numbers = #tpu.dot_dimension_numbers<[1], [0], [0], [1], [0, 0, 1, 1], [], []>} : vector<8x256xbf16>, vector<256x128xbf16>, vector<8x128xf32> -> vector<8x128xf32>
    %c0_15 = arith.constant 0 : index
    %c0_16 = arith.constant 0 : index
    %20 = vector.load %arg7[%c0_15, %c0_16] : memref<1x128xf32, #tpu.memory_space<vmem>>, vector<1x128xf32>
    %21 = vector.broadcast %20 : vector<1x128xf32> to vector<8x128xf32>
    %22 = arith.addf %19, %21 : vector<8x128xf32>
    %cst_17 = arith.constant 0.000000e+00 : f32
    %23 = vector.broadcast %cst_17 : f32 to vector<8x128xf32>
    %24 = arith.maximumf %22, %23 : vector<8x128xf32>
    %c0_18 = arith.constant 0 : index
    %c0_19 = arith.constant 0 : index
    %25 = vector.load %arg8[%c0_18, %c0_19] : memref<1x128xf32, #tpu.memory_space<vmem>>, vector<1x128xf32>
    %26 = vector.broadcast %25 : vector<1x128xf32> to vector<8x128xf32>
    %27 = arith.mulf %24, %26 : vector<8x128xf32>
    %cst_20 = arith.constant dense<0.000000e+00> : vector<8xf32>
    %28 = vector.multi_reduction <add>, %27, %cst_20 [1] : vector<8x128xf32> to vector<8xf32>
    %c0_21 = arith.constant 0 : index
    %29 = memref.load %arg9[%c0_21] : memref<1xf32, #tpu.memory_space<smem>>
    %30 = vector.broadcast %29 : f32 to vector<8xf32>
    %31 = arith.addf %28, %30 : vector<8xf32>
    %32 = vector.shape_cast %31 : vector<8xf32> to vector<1x8xf32>
    %c0_22 = arith.constant 0 : index
    %c0_23 = arith.constant 0 : index
    %33 = vector.load %arg10[%c0_22, %c0_23] : memref<1x8xf32, #tpu.memory_space<vmem>>, vector<1x8xf32>
    tpu.vector_store %arg10[%c0_22, %c0_23], %32 {strides = array<i32>} : memref<1x8xf32, #tpu.memory_space<vmem>>, vector<1x8xf32>,
    return
  }
  func.func @transform_0(%arg0: i32) -> (i32, i32) {
    %c0_i32 = arith.constant 0 : i32
    %c0_i32_0 = arith.constant 0 : i32
    return %arg0, %c0_i32 : i32, i32
  }
  func.func @transform_1(%arg0: i32) -> (i32, i32) {
    %c0_i32 = arith.constant 0 : i32
    %c0_i32_0 = arith.constant 0 : i32
    %c0_i32_1 = arith.constant 0 : i32
    return %c0_i32, %c0_i32_0 : i32, i32
  }
  func.func @transform_2(%arg0: i32) -> (i32, i32) {
    %c0_i32 = arith.constant 0 : i32
    %c0_i32_0 = arith.constant 0 : i32
    %c0_i32_1 = arith.constant 0 : i32
    return %c0_i32, %c0_i32_0 : i32, i32
  }
  func.func @transform_3(%arg0: i32) -> (i32, i32) {
    %c0_i32 = arith.constant 0 : i32
    %c0_i32_0 = arith.constant 0 : i32
    %c0_i32_1 = arith.constant 0 : i32
    return %c0_i32, %c0_i32_0 : i32, i32
  }
  func.func @transform_4(%arg0: i32) -> (i32, i32) {
    %c0_i32 = arith.constant 0 : i32
    %c0_i32_0 = arith.constant 0 : i32
    %c0_i32_1 = arith.constant 0 : i32
    return %c0_i32, %c0_i32_0 : i32, i32
  }
  func.func @transform_5(%arg0: i32) -> (i32, i32) {
    %c0_i32 = arith.constant 0 : i32
    %c0_i32_0 = arith.constant 0 : i32
    %c0_i32_1 = arith.constant 0 : i32
    return %c0_i32, %c0_i32_0 : i32, i32
  }
  func.func @transform_6(%arg0: i32) -> (i32, i32) {
    %c0_i32 = arith.constant 0 : i32
    %c0_i32_0 = arith.constant 0 : i32
    %c0_i32_1 = arith.constant 0 : i32
    return %c0_i32, %c0_i32_0 : i32, i32
  }
  func.func @transform_7(%arg0: i32) -> (i32, i32) {
    %c0_i32 = arith.constant 0 : i32
    %c0_i32_0 = arith.constant 0 : i32
    %c0_i32_1 = arith.constant 0 : i32
    return %c0_i32, %c0_i32_0 : i32, i32
  }
  func.func @transform_8(%arg0: i32) -> i32 {
    %c0_i32 = arith.constant 0 : i32
    %c0_i32_0 = arith.constant 0 : i32
    return %c0_i32 : i32
  }
  func.func @transform_9(%arg0: i32) -> (i32, i32) {
    %c0_i32 = arith.constant 0 : i32
    %c0_i32_0 = arith.constant 0 : i32
    return %arg0, %c0_i32 : i32, i32
  }
}

</mosaic_0001>

<bundles_post_ra>
// kernel: heuristic_mlp_forward.1
= control target key start
LH: loop header
LB: loop body
LE: loop exit
PB: predicated region body
PF: predicated region fallthrough
CT: control target
= control target key end

     0   :  { %vm277_vm0 = vcmask 130048   ;;  %s1866_s0 = inlined_call_operand.vmem [shape: f32[8,144], index: 0, kind: input, shape index: {}]   ;;  %s1867_s1 = inlined_call_operand.vmem [shape: bf16[144,512], index: 1, kind: input, shape index: {}]   ;;  %s1868_s2 = inlined_call_operand.vmem [shape: f32[1,512], index: 2, kind: input, shape index: {}]   ;;  %s1869_s3 = inlined_call_operand.vmem [shape: bf16[512,256], index: 3, kind: input, shape index: {}]   ;;  %s1870_s4 = inlined_call_operand.vmem [shape: f32[1,256], index: 4, kind: input, shape index: {}]   ;;  %s1871_s5 = inlined_call_operand.vmem [shape: bf16[256,128], index: 5, kind: input, shape index: {}]   ;;  %s1872_s6 = inlined_call_operand.vmem [shape: f32[1,128], index: 6, kind: input, shape index: {}]   ;;  %s1873_s7 = inlined_call_operand.vmem [shape: f32[1,128], index: 7, kind: input, shape index: {}]   ;;  %s1874_s8 = inlined_call_operand.<no memory space> [shape: f32[1], index: 8, kind: input, shape index: {}]   ;;  %s1875_s9 = inlined_call_operand.hbm [shape: f32[1,8], index: 9, kind: output, shape index: {}]  }
   0x1   :  { %v1215_v0 = vld [vmem:[%s1867_s1 + $0x4] ss:$16 sps:$4 sm:$0xff]   ;;  %v1217_v1 = vld [vmem:[%s1867_s1] ss:$16 sps:$4 sm:$0xff]   ;;  %v36_v9 = vld [vmem:[%s1866_s0 + $0x8] sm:$0xff] }
   0x2   :  { %281 = vmatprep.subr.bf16.mxu1 %v1215_v0  ;;  %v1218_v2 = vld [vmem:[%s1867_s1 + $0x24] ss:$16 sps:$4 sm:$0xff]   ;;  %v1220_v3 = vld [vmem:[%s1867_s1 + $0x20] ss:$16 sps:$4 sm:$0xff]   ;;  %v38_v10 = vpack.c.bf16 %v36_v9, %v36_v9  ;;  %v1244_v26 = vld [vmem:[%s1867_s1 + $0xc] ss:$16 sps:$4 sm:$0xff]  }
   0x3   :  { %282 = vmatpush1.bf16.msra.mxu1 %v1217_v1  ;;  %v1221_v4 = vld [vmem:[%s1867_s1 + $0x44] ss:$16 sps:$4 sm:$0xff]   ;;  %v1223_v5 = vld [vmem:[%s1867_s1 + $0x40] ss:$16 sps:$4 sm:$0xff]   ;;  %v1242_v30 = vld [vmem:[%s1867_s1 + $0x8] ss:$16 sps:$4 sm:$0xff]  }
   0x4   :  { %283 = vmatprep.subr.bf16.mxu1 %v1218_v2  ;;  %v1224_v6 = vld [vmem:[%s1867_s1 + $0x64] ss:$16 sps:$4 sm:$0xff]   ;;  %v1226_v7 = vld [vmem:[%s1867_s1 + $0x60] ss:$16 sps:$4 sm:$0xff]   ;;  %1102 = vmatprep.mubr.msk.bf16.mxu1 %vm277_vm0, %v38_v10  ;;  %v1247_v31 = vld [vmem:[%s1867_s1 + $0x2c] ss:$16 sps:$4 sm:$0xff]  }
   0x5   :  { %v1227_v8 = vld [vmem:[%s1867_s1 + $0x84] ss:$16 sps:$4 sm:$0xff]   ;;  %v1229_v11 = vld [vmem:[%s1867_s1 + $0x80] ss:$16 sps:$4 sm:$0xff]   ;;  %v1245_v34 = vld [vmem:[%s1867_s1 + $0x28] ss:$16 sps:$4 sm:$0xff]  }
   0x6   :  { %v1230_v12 = vld [vmem:[%s1867_s1 + $0xa4] ss:$16 sps:$4 sm:$0xff]   ;;  %v1232_v13 = vld [vmem:[%s1867_s1 + $0xa0] ss:$16 sps:$4 sm:$0xff]   ;;  %v1250_v35 = vld [vmem:[%s1867_s1 + $0x4c] ss:$16 sps:$4 sm:$0xff]  }
   0x7   :  { %284 = vmatpush1.bf16.msra.mxu1 %v1220_v3  ;;  %v1233_v14 = vld [vmem:[%s1867_s1 + $0xc4] ss:$16 sps:$4 sm:$0xff]   ;;  %v1235_v15 = vld [vmem:[%s1867_s1 + $0xc0] ss:$16 sps:$4 sm:$0xff]   ;;  %v1248_v37 = vld [vmem:[%s1867_s1 + $0x48] ss:$16 sps:$4 sm:$0xff]  }
   0x8   :  { %285 = vmatprep.subr.bf16.mxu1 %v1221_v4  ;;  %v1236_v16 = vld [vmem:[%s1867_s1 + $0xe4] ss:$16 sps:$4 sm:$0xff]   ;;  %v1271_v18 = vld [vmem:[%s1869_s3] ss:$8 sps:$4 sm:$0xff]   ;;  %v1274_v22 = vld [vmem:[%s1869_s3 + $0x10] ss:$8 sps:$4 sm:$0xff]  }
   0x9   :  { %v1269_v17 = vld [vmem:[%s1869_s3 + $0x4] ss:$8 sps:$4 sm:$0xff]   ;;  %v1272_v19 = vld [vmem:[%s1869_s3 + $0x14] ss:$8 sps:$4 sm:$0xff]   ;;  %v1238_v20 = vld [vmem:[%s1867_s1 + $0xe0] ss:$16 sps:$4 sm:$0xff]  }
   0xa   :  { %767 = vmatprep.subr.bf16.mxu0 %v1269_v17  ;;  %v1239_v21 = vld [vmem:[%s1867_s1 + $0x104] ss:$16 sps:$4 sm:$0xff]   ;;  %v1241_v24 = vld [vmem:[%s1867_s1 + $0x100] ss:$16 sps:$4 sm:$0xff]   ;;  %v1253_v39 = vld [vmem:[%s1867_s1 + $0x6c] ss:$16 sps:$4 sm:$0xff]  }
   0xb   :  { %286 = vmatpush1.bf16.msra.mxu1 %v1223_v5  ;;  %768 = vmatpush1.bf16.msra.mxu0 %v1271_v18  ;;  %v1275_v23 = vld [vmem:[%s1869_s3 + $0x24] ss:$8 sps:$4 sm:$0xff]   ;;  %v1277_v27 = vld [vmem:[%s1869_s3 + $0x20] ss:$8 sps:$4 sm:$0xff]   ;;  %v1278_v28 = vld [vmem:[%s1869_s3 + $0x34] ss:$8 sps:$4 sm:$0xff]  }
   0xc   :  { %287 = vmatprep.subr.bf16.mxu1 %v1224_v6  ;;  %769 = vmatprep.subr.bf16.mxu0 %v1272_v19  ;;  %v35_v25 = vld [vmem:[%s1866_s0] sm:$0xff]  ;;  %v1280_v32 = vld [vmem:[%s1869_s3 + $0x30] ss:$8 sps:$4 sm:$0xff]   ;;  %v1284_v38 = vld [vmem:[%s1869_s3 + $0x54] ss:$8 sps:$4 sm:$0xff]  }
   0xd   :  { %v1541_v29 = vpack.c.bf16 %v35_v25, %v35_v25  ;;  %v1281_v33 = vld [vmem:[%s1869_s3 + $0x44] ss:$8 sps:$4 sm:$0xff]   ;;  %v1283_v36 = vld [vmem:[%s1869_s3 + $0x40] ss:$8 sps:$4 sm:$0xff]   ;;  %v1286_v40 = vld [vmem:[%s1869_s3 + $0x50] ss:$8 sps:$4 sm:$0xff]  }
   0xe   :  { %v1287_v41 = vld [vmem:[%s1869_s3 + $0x64] ss:$8 sps:$4 sm:$0xff]   ;;  %v1251_v42 = vld [vmem:[%s1867_s1 + $0x68] ss:$16 sps:$4 sm:$0xff]   ;;  %v1290_v45 = vld [vmem:[%s1869_s3 + $0x74] ss:$8 sps:$4 sm:$0xff]  }
   0xf   :  { %288 = vmatpush1.bf16.msra.mxu1 %v1226_v7  ;;  %770 = vmatpush1.bf16.msra.mxu0 %v1274_v22  ;;  %v1256_v43 = vld [vmem:[%s1867_s1 + $0x8c] ss:$16 sps:$4 sm:$0xff]   ;;  %v1289_v44 = vld [vmem:[%s1869_s3 + $0x60] ss:$8 sps:$4 sm:$0xff]   ;;  %v1292_v48 = vld [vmem:[%s1869_s3 + $0x70] ss:$8 sps:$4 sm:$0xff]  }
  0x10   :  { %289 = vmatprep.subr.bf16.mxu1 %v1227_v8  ;;  %771 = vmatprep.subr.bf16.mxu0 %v1275_v23  ;;  %v1254_v46 = vld [vmem:[%s1867_s1 + $0x88] ss:$16 sps:$4 sm:$0xff]   ;;  %v1259_v47 = vld [vmem:[%s1867_s1 + $0xac] ss:$16 sps:$4 sm:$0xff]  }
  0x11   :  { %v1293_v49 = vld [vmem:[%s1869_s3 + $0x84] ss:$8 sps:$4 sm:$0xff]   ;;  %v1257_v50 = vld [vmem:[%s1867_s1 + $0xa8] ss:$16 sps:$4 sm:$0xff]   ;;  %v1296_v53 = vld [vmem:[%s1869_s3 + $0x94] ss:$8 sps:$4 sm:$0xff]  }
  0x12   :  { %v1262_v51 = vld [vmem:[%s1867_s1 + $0xcc] ss:$16 sps:$4 sm:$0xff]   ;;  %v1295_v52 = vld [vmem:[%s1869_s3 + $0x80] ss:$8 sps:$4 sm:$0xff]   ;;  %v1298_v56 = vld [vmem:[%s1869_s3 + $0x90] ss:$8 sps:$4 sm:$0xff]  }
  0x13   :  { %290 = vmatpush1.bf16.msra.mxu1 %v1229_v11  ;;  %772 = vmatpush1.bf16.msra.mxu0 %v1277_v27  ;;  %v1260_v54 = vld [vmem:[%s1867_s1 + $0xc8] ss:$16 sps:$4 sm:$0xff]   ;;  %v1265_v55 = vld [vmem:[%s1867_s1 + $0xec] ss:$16 sps:$4 sm:$0xff]  }
  0x14   :  { %291 = vmatprep.subr.bf16.mxu1 %v1230_v12  ;;  %773 = vmatprep.subr.bf16.mxu0 %v1278_v28  ;;  %v1299_v57 = vld [vmem:[%s1869_s3 + $0xa4] ss:$8 sps:$4 sm:$0xff]   ;;  %v1263_v58 = vld [vmem:[%s1867_s1 + $0xe8] ss:$16 sps:$4 sm:$0xff]   ;;  %v1302_v61 = vld [vmem:[%s1869_s3 + $0xb4] ss:$8 sps:$4 sm:$0xff]  }
  0x15   :  { %v1268_v59 = vld [vmem:[%s1867_s1 + $0x10c] ss:$16 sps:$4 sm:$0xff]   ;;  %v1301_v60 = vld [vmem:[%s1869_s3 + $0xa0] ss:$8 sps:$4 sm:$0xff]  }
  0x17   :  { %292 = vmatpush1.bf16.msra.mxu1 %v1232_v13  ;;  %774 = vmatpush1.bf16.msra.mxu0 %v1280_v32 }
  0x18   :  { %293 = vmatprep.subr.bf16.mxu1 %v1233_v14  ;;  %775 = vmatprep.subr.bf16.mxu0 %v1281_v33 }
  0x1b   :  { %294 = vmatpush1.bf16.msra.mxu1 %v1235_v15  ;;  %776 = vmatpush1.bf16.msra.mxu0 %v1283_v36 }
  0x1c   :  { %295 = vmatprep.subr.bf16.mxu1 %v1236_v16  ;;  %777 = vmatprep.subr.bf16.mxu0 %v1284_v38 }
  0x1f   :  { %296 = vmatpush1.bf16.msra.mxu1 %v1238_v20  ;;  %778 = vmatpush1.bf16.msra.mxu0 %v1286_v40 }
  0x20   :  { %297 = vmatprep.subr.bf16.mxu1 %v1239_v21  ;;  %779 = vmatprep.subr.bf16.mxu0 %v1287_v41 }
  0x23   :  { %298 = vmatpush1.bf16.msra.mxu1 %v1241_v24  ;;  %780 = vmatpush1.bf16.msra.mxu0 %v1289_v44 }
  0x24   :  { %322 = vmatprep.subr.bf16.mxu1 %v1244_v26  ;;  %781 = vmatprep.subr.bf16.mxu0 %v1290_v45 }
  0x26   :  { %314 = vmatmul.mubr.bf16.vlgmr.msra.gmra.mrb[0].mxu1 %v1541_v29 }
  0x27   :  { %323 = vmatpush1.bf16.msra.mxu1 %v1242_v30  ;;  %1103 = vmatprep.mubr.msk.bf16.mxu1 %vm277_vm0, %v38_v10 }
  0x28   :  { %324 = vmatprep.subr.bf16.mxu1 %v1247_v31  ;;  %782 = vmatpush1.bf16.msra.mxu0 %v1292_v48 }
  0x29   :  { %783 = vmatprep.subr.bf16.mxu0 %v1293_v49 }
  0x2b   :  { %325 = vmatpush1.bf16.msra.mxu1 %v1245_v34 }
  0x2c   :  { %326 = vmatprep.subr.bf16.mxu1 %v1250_v35  ;;  %784 = vmatpush1.bf16.msra.mxu0 %v1295_v52 }
  0x2d   :  { %785 = vmatprep.subr.bf16.mxu0 %v1296_v53 }
  0x2f   :  { %327 = vmatpush1.bf16.msra.mxu1 %v1248_v37 }
  0x30   :  { %328 = vmatprep.subr.bf16.mxu1 %v1253_v39  ;;  %786 = vmatpush1.bf16.msra.mxu0 %v1298_v56 }
  0x31   :  { %787 = vmatprep.subr.bf16.mxu0 %v1299_v57 }
  0x33   :  { %329 = vmatpush1.bf16.msra.mxu1 %v1251_v42 }
  0x34   :  { %330 = vmatprep.subr.bf16.mxu1 %v1256_v43 }
  0x37   :  { %331 = vmatpush1.bf16.msra.mxu1 %v1254_v46 }
  0x38   :  { %332 = vmatprep.subr.bf16.mxu1 %v1259_v47 }
  0x3b   :  { %333 = vmatpush1.bf16.msra.mxu1 %v1257_v50 }
  0x3c   :  { %334 = vmatprep.subr.bf16.mxu1 %v1262_v51 }
  0x3f   :  { %335 = vmatpush1.bf16.msra.mxu1 %v1260_v54 }
  0x40   :  { %336 = vmatprep.subr.bf16.mxu1 %v1265_v55 }
  0x41   :  { %15 = vsyncpa [#allocation4], 0  ;;  %v1266_v62 = vld [vmem:[%s1867_s1 + $0x108] ss:$16 sps:$4 sm:$0xff]   ;;  %788 = vmatpush1.bf16.msra.mxu0 %v1301_v60  ;;  %v1305_v0 = vld [vmem:[%s1869_s3 + $0xc4] ss:$8 sps:$4 sm:$0xff]   ;;  %v77_v21 = vlaneseq }
  0x42   :  { %v1304_v63 = vld [vmem:[%s1869_s3 + $0xb0] ss:$8 sps:$4 sm:$0xff]   ;;  %789 = vmatprep.subr.bf16.mxu0 %v1302_v61  ;;  %v1307_v1 = vld [vmem:[%s1869_s3 + $0xc0] ss:$8 sps:$4 sm:$0xff]   ;;  %v1308_v2 = vld [vmem:[%s1869_s3 + $0xd4] ss:$8 sps:$4 sm:$0xff]  }
  0x43   :  { %337 = vmatpush1.bf16.msra.mxu1 %v1263_v58  ;;  %v1310_v3 = vld [vmem:[%s1869_s3 + $0xd0] ss:$8 sps:$4 sm:$0xff]   ;;  %v1311_v4 = vld [vmem:[%s1869_s3 + $0xe4] ss:$8 sps:$4 sm:$0xff]   ;;  %v1313_v5 = vld [vmem:[%s1869_s3 + $0xe0] ss:$8 sps:$4 sm:$0xff]  }
  0x44   :  { %338 = vmatprep.subr.bf16.mxu1 %v1268_v59  ;;  %v1314_v6 = vld [vmem:[%s1869_s3 + $0xf4] ss:$8 sps:$4 sm:$0xff]   ;;  %v1316_v7 = vld [vmem:[%s1869_s3 + $0xf0] ss:$8 sps:$4 sm:$0xff]   ;;  %v1319_v8 = vld [vmem:[%s1869_s3 + $0x104] ss:$8 sps:$4 sm:$0xff]  }
  0x45   :  { %790 = vmatpush1.bf16.msra.mxu0 %v1304_v63  ;;  %v1365_v9 = vld [vmem:[%s1871_s5 + $0x40] sm:$0xff]   ;;  %v1367_v11 = vld [vmem:[%s1871_s5 + $0x48] sm:$0xff]   ;;  %v1369_v13 = vld [vmem:[%s1871_s5 + $0x50] sm:$0xff]   ;;  %v1712_v22 = vshrl.u32 %v77_v21, 7  ;;  %vm1050_vm1 = vcmask 57344  }
  0x46   :  { %791 = vmatprep.subr.bf16.mxu0 %v1305_v0  ;;  %v1366_v10 = vld [vmem:[%s1871_s5] sm:$0xff]   ;;  %v1368_v12 = vld [vmem:[%s1871_s5 + $0x8] sm:$0xff]   ;;  %v1370_v14 = vld [vmem:[%s1871_s5 + $0x10] sm:$0xff]  }
  0x47   :  { %339 = vmatpush1.bf16.msra.mxu1 %v1266_v62  ;;  %v1371_v15 = vld [vmem:[%s1871_s5 + $0x58] sm:$0xff]   ;;  %v1373_v17 = vld [vmem:[%s1871_s5 + $0x60] sm:$0xff]   ;;  %v1375_v19 = vld [vmem:[%s1871_s5 + $0x68] sm:$0xff]   ;;  %v79_v23 = vsub.s32 0, %v1712_v22  ;;  %v83_v25 = vsub.s32 1, %v1712_v22  ;;  %v91_v51 = vsub.s32 3, %v1712_v22 }
  0x48   :  { %1186 = vmatprep.subr.bf16.mxu1 %v1365_v9  ;;  %v1372_v16 = vld [vmem:[%s1871_s5 + $0x18] sm:$0xff]   ;;  %v1374_v18 = vld [vmem:[%s1871_s5 + $0x20] sm:$0xff]   ;;  %v1376_v20 = vld [vmem:[%s1871_s5 + $0x28] sm:$0xff]  }
  0x49   :  { %792 = vmatpush1.bf16.msra.mxu0 %v1307_v1  ;;  %v1718_v24 = vld [vmem:[%s1868_s2] sm:$0xf]  ;;  %v1322_v39 = vld [vmem:[%s1869_s3 + $0x114] ss:$8 sps:$4 sm:$0xff]   ;;  %v1320_v40 = vld [vmem:[%s1869_s3 + $0x110] ss:$8 sps:$4 sm:$0xff]  }
  0x4a   :  { %355 = vmatmul.mubr.bf16.vlgmr.msra.gmra.mrb[4].mxu1 %v1541_v29  ;;  %793 = vmatprep.subr.bf16.mxu0 %v1308_v2  ;;  %v80_v26 = vrot.slane %v1718_v24, %v79_v23  ;;  %v84_v27 = vrot.slane %v1718_v24, %v83_v25  ;;  %v1317_v37 = vld [vmem:[%s1869_s3 + $0x100] ss:$8 sps:$4 sm:$0xff]   ;;  %v1325_v41 = vld [vmem:[%s1869_s3 + $0x124] ss:$8 sps:$4 sm:$0xff]   ;;  %v1328_v43 = vld [vmem:[%s1869_s3 + $0x134] ss:$8 sps:$4 sm:$0xff]   ;;  %v92_v54 = vrot.slane %v1718_v24, %v91_v51 }
  0x4b   :  { %1187 = vmatpush3.bf16.msra.mxu1 %v1366_v10  ;;  %v1323_v42 = vld [vmem:[%s1869_s3 + $0x120] ss:$8 sps:$4 sm:$0xff]   ;;  %v1326_v44 = vld [vmem:[%s1869_s3 + $0x130] ss:$8 sps:$4 sm:$0xff]   ;;  %v1331_v45 = vld [vmem:[%s1869_s3 + $0x144] ss:$8 sps:$4 sm:$0xff]  }
  0x4c   :  { %1188 = vmatprep.subr.bf16.mxu1 %v1367_v11  ;;  %v1329_v46 = vld [vmem:[%s1869_s3 + $0x140] ss:$8 sps:$4 sm:$0xff]   ;;  %v1334_v47 = vld [vmem:[%s1869_s3 + $0x154] ss:$8 sps:$4 sm:$0xff]   ;;  %v1332_v48 = vld [vmem:[%s1869_s3 + $0x150] ss:$8 sps:$4 sm:$0xff]  }
  0x4d   :  { %794 = vmatpush1.bf16.msra.mxu0 %v1310_v3  ;;  %v1337_v49 = vld [vmem:[%s1869_s3 + $0x164] ss:$8 sps:$4 sm:$0xff]   ;;  %v1335_v50 = vld [vmem:[%s1869_s3 + $0x160] ss:$8 sps:$4 sm:$0xff]   ;;  %v1340_v52 = vld [vmem:[%s1869_s3 + $0x174] ss:$8 sps:$4 sm:$0xff]  }
  0x4e   :  { %795 = vmatprep.subr.bf16.mxu0 %v1311_v4  ;;  %v1338_v53 = vld [vmem:[%s1869_s3 + $0x170] ss:$8 sps:$4 sm:$0xff]   ;;  %v1343_v55 = vld [vmem:[%s1869_s3 + $0x184] ss:$8 sps:$4 sm:$0xff]   ;;  %v1341_v58 = vld [vmem:[%s1869_s3 + $0x180] ss:$8 sps:$4 sm:$0xff]  }
  0x4f   :  { %1189 = vmatpush3.bf16.msra.mxu1 %v1368_v12  ;;  %v1346_v61 = vld [vmem:[%s1869_s3 + $0x194] ss:$8 sps:$4 sm:$0xff]   ;;  %v1344_v0 = vld [vmem:[%s1869_s3 + $0x190] ss:$8 sps:$4 sm:$0xff]   ;;  %v1349_v2 = vld [vmem:[%s1869_s3 + $0x1a4] ss:$8 sps:$4 sm:$0xff]  }
  0x50   :  { %1190 = vmatprep.subr.bf16.mxu1 %v1369_v13  ;;  %v1347_v3 = vld [vmem:[%s1869_s3 + $0x1a0] ss:$8 sps:$4 sm:$0xff]   ;;  %v1352_v4 = vld [vmem:[%s1869_s3 + $0x1b4] ss:$8 sps:$4 sm:$0xff]   ;;  %v1356_v10 = vld [vmem:[%s1869_s3 + $0x1d0] ss:$8 sps:$4 sm:$0xff]  }
  0x51   :  { %796 = vmatpush1.bf16.msra.mxu0 %v1313_v5  ;;  %v1350_v5 = vld [vmem:[%s1869_s3 + $0x1b0] ss:$8 sps:$4 sm:$0xff]   ;;  %v1358_v9 = vld [vmem:[%s1869_s3 + $0x1d4] ss:$8 sps:$4 sm:$0xff]   ;;  %v1361_v12 = vld [vmem:[%s1869_s3 + $0x1e4] ss:$8 sps:$4 sm:$0xff]  }
  0x52   :  { %797 = vmatprep.subr.bf16.mxu0 %v1314_v6  ;;  %v1355_v6 = vld [vmem:[%s1869_s3 + $0x1c4] ss:$8 sps:$4 sm:$0xff]   ;;  %v1359_v13 = vld [vmem:[%s1869_s3 + $0x1e0] ss:$8 sps:$4 sm:$0xff]  }
  0x53   :  { %1191 = vmatpush3.bf16.msra.mxu1 %v1370_v14 }
  0x54   :  { %1192 = vmatprep.subr.bf16.mxu1 %v1371_v15  ;;  %v1364_v15 = vld [vmem:[%s1869_s3 + $0x1f4] ss:$8 sps:$4 sm:$0xff]  }
  0x55   :  { %798 = vmatpush1.bf16.msra.mxu0 %v1316_v7  ;;  %v1353_v7 = vld [vmem:[%s1869_s3 + $0x1c0] ss:$8 sps:$4 sm:$0xff]  }
  0x56   :  { %808 = vmatprep.subr.bf16.mxu0 %v1319_v8  ;;  %v87_v8 = vsub.s32 2, %v1712_v22 }
  0x57   :  { %1193 = vmatpush3.bf16.msra.mxu1 %v1372_v16  ;;  %v1362_v16 = vld [vmem:[%s1869_s3 + $0x1f0] ss:$8 sps:$4 sm:$0xff]  }
  0x58   :  { %1194 = vmatprep.subr.bf16.mxu1 %v1373_v17  ;;  %v88_v11 = vrot.slane %v1718_v24, %v87_v8  ;;  %v1379_v24 = vld [vmem:[%s1871_s5 + $0x78] sm:$0xff]  }
  0x5b   :  { %1195 = vmatpush3.bf16.msra.mxu1 %v1374_v18 }
  0x5c   :  { %1196 = vmatprep.subr.bf16.mxu1 %v1375_v19  ;;  %v1377_v19 = vld [vmem:[%s1871_s5 + $0x70] sm:$0xff]  }
  0x5f   :  { %1197 = vmatpush3.bf16.msra.mxu1 %v1376_v20  ;;  %v1378_v20 = vld [vmem:[%s1871_s5 + $0x30] sm:$0xff]  }
  0x60   :  { %1198 = vmatprep.subr.bf16.mxu1 %v1377_v19 }
  0x63   :  { %1199 = vmatpush3.bf16.msra.mxu1 %v1378_v20 }
  0x64   :  { %1200 = vmatprep.subr.bf16.mxu1 %v1379_v24 }
  0xf9   :  { %v315_v28 = vpop.f32.mrb[0].mxu1 }
  0xfa   :  { %v316_v29 = vadd.f32 %v315_v28, %v80_v26  ;;  %v317_v30 = vpop.f32.mrb[1].mxu1  ;;  %v1380_v26 = vld [vmem:[%s1871_s5 + $0x38] sm:$0xff]  }
  0xfb   :  { %v318_v31 = vadd.f32 %v317_v30, %v84_v27  ;;  %v319_v32 = vpop.f32.mrb[2].mxu1  ;;  %1201 = vmatpush3.bf16.msra.mxu1 %v1380_v26  ;;  %v435_v27 = vld [vmem:[%s1870_s4] sm:$0x3] }
  0xfc   :  { %v363_v33 = vmax.f32 %v316_v29, 0.0  ;;  %v320_v34 = vpop.f32.mrb[3].mxu1  ;;  %v440_v28 = vrot.slane %v435_v27, %v79_v23  ;;  %v444_v29 = vrot.slane %v435_v27, %v83_v25  ;;  %v1168_v23 = vld [vmem:[%s1872_s6] ss:$0 sm:$0xff]  ;;  %s1405_s6 = smov [#allocation3]  }
  0xfd   :  { %v364_v35 = vmax.f32 %v318_v31, 0.0  ;;  %s1058_s24 = sshll.u32 %s1405_s6, 4  ;;  %s1059_s24 = int_to_ptr.vmem [resolvable:$true] %s1058_s24 }
  0xfe   :  { %v367_v38 = vpack.c.bf16 %v363_v33, %v363_v33  ;;  %s1385_s25 = scalar_lea.vmem %s1059_s24, 32  ;;  %p1386_p1 = scmp.lt.s32.totalorder %s1059_s24, %s1059_s24 }
  0xff   :  { %v368_v36 = vpack.c.bf16 %v364_v35, %v364_v35 }
 0x101   :  { %799 = vmatprep.mubr.bf16.mxu0 %v368_v36 }
 0x102   :  { %800 = vmatmul.mubr.bf16.vlgmr.msra.gmra.mrb[0].mxu0 %v367_v38 }
 0x103   :  { %809 = vmatpush1.bf16.msra.mxu0 %v1317_v37 }
 0x104   :  { %810 = vmatprep.subr.bf16.mxu0 %v1322_v39 }
 0x107   :  { %811 = vmatpush1.bf16.msra.mxu0 %v1320_v40 }
 0x108   :  { %812 = vmatprep.subr.bf16.mxu0 %v1325_v41 }
 0x10b   :  { %813 = vmatpush1.bf16.msra.mxu0 %v1323_v42 }
 0x10c   :  { %814 = vmatprep.subr.bf16.mxu0 %v1328_v43 }
 0x10f   :  { %815 = vmatpush1.bf16.msra.mxu0 %v1326_v44 }
 0x110   :  { %816 = vmatprep.subr.bf16.mxu0 %v1331_v45  ;;  %v1185_v45 = vld [vmem:[%s1873_s7] ss:$0 sm:$0xff]  ;;  %s1381_s7 = scalar_lea.vmem %s1059_s24, 16 }
 0x111   :  { %p1382_p0 = scmp.ne.s32.totalorder %s1059_s24, %s1381_s7  ;;  %p1387_p2 = scmp.lt.s32.totalorder %s1385_s25, %s1381_s7 }
 0x113   :  { %817 = vmatpush1.bf16.msra.mxu0 %v1329_v46  ;;  %p1388_p3 = por %p1387_p2, %p1386_p1 }
 0x114   :  { %818 = vmatprep.subr.bf16.mxu0 %v1334_v47 }
 0x115   :  { %p1389_p4 = pnand %p1388_p3, %p1382_p0 }
 0x117   :  { %819 = vmatpush1.bf16.msra.mxu0 %v1332_v48  ;;  %v1044_v48 = vand.u32 127, %v77_v21 }
 0x118   :  { %820 = vmatprep.subr.bf16.mxu0 %v1337_v49  ;;  %v1040_v49 = vstv %s1874_s8 }
 0x11b   :  { %821 = vmatpush1.bf16.msra.mxu0 %v1335_v50  ;;  %v1047_v50 = vsub.s32 %v1044_v48, %v1712_v22 }
 0x11c   :  { %822 = vmatprep.subr.bf16.mxu0 %v1340_v52 }
 0x11d   :  { %v356_v56 = vpop.f32.mrb[4].mxu1 }
 0x11e   :  { %v358_v57 = vpop.f32.mrb[5].mxu1  ;;  %v357_v14 = vadd.f32 %v356_v56, %v88_v11 }
 0x11f   :  { %823 = vmatpush1.bf16.msra.mxu0 %v1338_v53  ;;  %v359_v59 = vadd.f32 %v358_v57, %v92_v54  ;;  %v360_v60 = vpop.f32.mrb[6].mxu1 }
 0x120   :  { %824 = vmatprep.subr.bf16.mxu0 %v1343_v55  ;;  %v361_v62 = vpop.f32.mrb[7].mxu1  ;;  %v365_v17 = vmax.f32 %v357_v14, 0.0 }
 0x121   :  { %v366_v63 = vmax.f32 %v359_v59, 0.0 }
 0x122   :  { %v369_v18 = vpack.c.bf16 %v365_v17, %v365_v17 }
 0x123   :  { %825 = vmatpush1.bf16.msra.mxu0 %v1341_v58  ;;  %v370_v1 = vpack.c.bf16 %v366_v63, %v366_v63 }
 0x124   :  { %826 = vmatprep.subr.bf16.mxu0 %v1346_v61 }
 0x125   :  { %840 = vmatprep.mubr.bf16.mxu0 %v370_v1 }
 0x127   :  { %827 = vmatpush1.bf16.msra.mxu0 %v1344_v0 }
 0x128   :  { %828 = vmatprep.subr.bf16.mxu0 %v1349_v2 }
 0x12b   :  { %829 = vmatpush1.bf16.msra.mxu0 %v1347_v3 }
 0x12c   :  { %830 = vmatprep.subr.bf16.mxu0 %v1352_v4 }
 0x12f   :  { %831 = vmatpush1.bf16.msra.mxu0 %v1350_v5 }
 0x130   :  { %832 = vmatprep.subr.bf16.mxu0 %v1355_v6 }
 0x133   :  { %833 = vmatpush1.bf16.msra.mxu0 %v1353_v7 }
 0x134   :  { %834 = vmatprep.subr.bf16.mxu0 %v1358_v9 }
 0x137   :  { %835 = vmatpush1.bf16.msra.mxu0 %v1356_v10 }
 0x138   :  { %836 = vmatprep.subr.bf16.mxu0 %v1361_v12 }
 0x13b   :  { %837 = vmatpush1.bf16.msra.mxu0 %v1359_v13 }
 0x13c   :  { %838 = vmatprep.subr.bf16.mxu0 %v1364_v15 }
 0x13f   :  { %839 = vmatpush1.bf16.msra.mxu0 %v1362_v16 }
 0x142   :  { %841 = vmatmul.mubr.bf16.vlgmr.msra.gmra.mrb[0].mxu0 %v369_v18 }
 0x215   :  { %v842_v30 = vpop.f32.mrb[0].mxu0 }
 0x216   :  { %v1208_v31 = vadd.f32 %v842_v30, %v440_v28  ;;  %v844_v32 = vpop.f32.mrb[1].mxu0 }
 0x217   :  { %v1209_v33 = vadd.f32 %v844_v32, %v444_v29  ;;  %v846_v34 = vpop.f32.mrb[2].mxu0 }
 0x218   :  { %v849_v35 = vmax.f32 %v1208_v31, 0.0  ;;  %v847_v36 = vpop.f32.mrb[3].mxu0 }
 0x219   :  { %v850_v37 = vmax.f32 %v1209_v33, 0.0 }
 0x21a   :  { %v851_v39 = vpack.c.bf16 %v849_v35, %v849_v35 }
 0x21b   :  { %v852_v38 = vpack.c.bf16 %v850_v37, %v850_v37 }
 0x21d   :  { %1020 = vmatprep.mubr.bf16.mxu1 %v852_v38 }
 0x21e   :  { %1021 = vmatmul.mubr.bf16.vlgmr.msra.gmra.mrb[8].mxu1 %v851_v39 }
 0x2f1   :  { %v1202_v40 = vpop.f32.mrb[8].mxu1 }
 0x2f2   :  { %v1203_v41 = vpop.f32.mrb[9].mxu1 }
 0x2f3   :  { %v1204_v42 = vadd.f32 %v1203_v41, %v1202_v40  ;;  %v1205_v25 = vpop.f32.mrb[10].mxu1 }
 0x2f4   :  { %v1206_v43 = vpop.f32.mrb[11].mxu1 }
 0x2f5   :  { %v1023_v44 = vadd.f32 %v1204_v42, %v1168_v23 }
 0x2f7   :  { %v1028_v46 = vmax.f32 %v1023_v44, 0.0 }
 0x2f9   :  { %v1036_v47 = vmul.f32 %v1185_v45, %v1028_v46 }
 0x2fb   :  { %1037 = vadd.xlane.f32.xlu0 %v1036_v47 }
 0x388   :  { %v1038_v51 = vpop.xlane.xlu0 %1037 }
 0x389   :  { %v1041_v52 = vadd.f32 %v1040_v49, %v1038_v51 }
 0x38b   :  { %v1048_v53 = vrot.slane %v1041_v52, %v1047_v50 }
 0x38d   :  { %1051 = vst.msk [vmem:[#allocation3] sm:$0x1] %vm1050_vm1, %v1048_v53 }
 0x38e   :  { %1392 = shalt.err (!%p1389_p4)
}
 0x38f   :  { %s1393_s27 = scalar_lea.hbm %s1875_s9, 16 }
 0x390   :  { %p1394_p5 = scmp.ne.s32.totalorder %s1875_s9, %s1393_s27  ;;  %p1397_p6 = scmp.lt.u32.totalorder %s1393_s27, %s1875_s9 }
 0x392   :  { %p1399_p7 = pnand %p1397_p6, %p1394_p5 }
 0x394   :  { %1402 = shalt.err (!%p1399_p7)
}
 0x395   :  { %1061 = dma.vmem_to_hbm [thread:$0]  %s1059_s24, 16, %s1875_s9, [#allocation4]  }
 0x396   :  { %1403 = dma.done.wait [#allocation4], 16  }
 0x397   :  { %1404 = vsyncadd [#allocation4], 4294967280 }
 0x398   :  { %1065 = vsyncpa [#allocation4], 1 }

</bundles_post_ra>
